<compile_context>
chip_gen: v7x
topology: tpu7x:2x2x1
jax: 0.10.0
libtpu: 0.0.40
codegen_flags: <defaults>
</compile_context>

<pallas_src>
import itertools
from functools import partial

import numpy as np
import jax
import jax.numpy as jnp
from jax.experimental import pallas as pl
from jax.experimental.pallas import tpu as pltpu


# ----------------------------- Pallas kernel --------------------------------
def _l1_cdist_kernel(a_ref, b_ref, o_ref):
    # a_ref : [D, tile_n]       predictions, transposed (lane-dense rows)
    # b_ref : [tile_t, D]       targets (tiny)
    # o_ref : [tile_t, tile_n]  transposed cost tile C_T[t, n]
    D = a_ref.shape[0]
    acc = jnp.zeros(o_ref.shape, dtype=jnp.float32)
    for d in range(D):  # D is tiny & static -> unrolled elementwise VPU ops
        # [1, tile_n] (sublane bcast, cheap) - [tile_t, 1] (tiny lane splat)
        acc = acc + jnp.abs(a_ref[d : d + 1, :] - b_ref[:, d : d + 1])
    o_ref[...] = acc


def _round_up(x, m):
    return ((x + m - 1) // m) * m


def _pick_tile(total, unit, max_tile, want_multiple_blocks):
    """Pick (tile, padded_total): tile is a multiple of `unit`, <= max_tile,
    padding waste <= ~6% of total, preferring the largest such tile.  If
    want_multiple_blocks, the tile is capped so the grid axis has >= 2 blocks."""
    k = pl.cdiv(max(total, 1), unit)        # base units needed
    d_max = max(1, max_tile // unit)
    if want_multiple_blocks and k >= 2:
        d_max = min(d_max, max(1, k // 2))  # >= 2 blocks (v7x megacore)
    d_max = min(d_max, k)
    waste_budget = max(0, k // 16)          # <= ~6.25% padded-column waste
    best_d = 1
    for d in range(1, d_max + 1):
        padded = -(-k // d) * d
        if padded - k <= waste_budget:
            best_d = d                       # larger tile preferred within budget
    padded = -(-k // best_d) * best_d
    return best_d * unit, padded * unit


def _choose_tiles(N, T, *, max_tile_n=2048, max_tile_t=256):
    tile_n, n_pad = _pick_tile(N, 128, max_tile_n, want_multiple_blocks=True)
    tile_t, t_pad = _pick_tile(T, 8, max_tile_t, want_multiple_blocks=False)
    return n_pad, t_pad, tile_n, tile_t


@partial(jax.jit, static_argnames=("n_pad", "t_pad", "tile_n", "tile_t"))
def _l1_cdist_t_padded(a, b, scale, *, n_pad, t_pad, tile_n, tile_t):
    """Returns C_T[t_pad, n_pad] = scale * L1-cdist(a, b), transposed & padded.
    a: [N, D] predictions, b: [T, D] targets."""
    N, D = a.shape
    T = b.shape[0]
    # Pre-scale the (tiny) inputs instead of the full cost matrix.
    a = a.astype(jnp.float32) * scale
    b = b.astype(jnp.float32) * scale
    # Layout plumbing (fused under jit): pred -> [D, N_pad], tgt -> [T_pad, D].
    a_t = jnp.zeros((D, n_pad), jnp.float32).at[:, :N].set(a.T)
    b_p = jnp.zeros((t_pad, D), jnp.float32).at[:T, :].set(b)

    grid = (t_pad // tile_t, n_pad // tile_n)
    return pl.pallas_call(
        _l1_cdist_kernel,
        out_shape=jax.ShapeDtypeStruct((t_pad, n_pad), jnp.float32),
        grid_spec=pltpu.PrefetchScalarGridSpec(
            num_scalar_prefetch=0,
            grid=grid,
            in_specs=[
                pl.BlockSpec((D, tile_n), lambda ti, ni: (0, ni)),
                pl.BlockSpec((tile_t, D), lambda ti, ni: (ti, 0)),
            ],
            out_specs=pl.BlockSpec((tile_t, tile_n), lambda ti, ni: (ti, ni)),
        ),
        compiler_params=pltpu.CompilerParams(
            dimension_semantics=("parallel", "parallel"),
        ),
    )(a_t, b_p)


def l1_cdist(a, b):
    """torch.cdist(a, b, p=1) equivalent, [N, D] x [T, D] -> [N, T] f32.
    Convenience/test path; the matcher consumes the padded transposed result
    directly to avoid the device-side transpose pass."""
    N = a.shape[0]
    T = b.shape[0]
    n_pad, t_pad, tile_n, tile_t = _choose_tiles(N, T)
    c_t = _l1_cdist_t_padded(
        a, b, jnp.float32(1.0),
        n_pad=n_pad, t_pad=t_pad, tile_n=tile_n, tile_t=tile_t)
    return c_t[:T, :N].T


# ---------------------- host-side assignment (tiny) --------------------------
# TODO(synk): linear_sum_assignment (Hungarian) is inherently sequential with
# data-dependent control flow; it stays host-side (NumPy Jonker-Volgenant).
def _linear_sum_assignment_np(cost):
    """Rectangular linear sum assignment (Jonker-Volgenant shortest augmenting
    path).  Same output contract as scipy.optimize.linear_sum_assignment:
    (row_ind, col_ind), len == min(cost.shape), row_ind sorted ascending."""
    cost = np.asarray(cost, dtype=np.float64)
    if cost.size == 0:
        return np.zeros(0, dtype=np.int64), np.zeros(0, dtype=np.int64)
    transposed = cost.shape[0] > cost.shape[1]
    if transposed:
        cost = cost.T
    n, m = cost.shape  # n <= m
    u = np.zeros(n + 1)
    v = np.zeros(m + 1)
    p = np.zeros(m + 1, dtype=np.int64)    # p[j]: row (1-based) matched to col j
    way = np.zeros(m + 1, dtype=np.int64)
    for i in range(1, n + 1):
        p[0] = i
        j0 = 0
        minv = np.full(m + 1, np.inf)
        used = np.zeros(m + 1, dtype=bool)
        while True:
            used[j0] = True
            i0 = p[j0]
            cur = cost[i0 - 1, :] - u[i0] - v[1:]
            improve = (~used[1:]) & (cur < minv[1:])
            minv[1:] = np.where(improve, cur, minv[1:])
            way[1:] = np.where(improve, j0, way[1:])
            masked = np.where(used[1:], np.inf, minv[1:])
            j1 = int(np.argmin(masked)) + 1
            delta = masked[j1 - 1]
            u[p[used]] += delta            # rows on the alternating tree are distinct
            v[used] -= delta
            minv[1:] = np.where(used[1:], minv[1:], minv[1:] - delta)
            j0 = j1
            if p[j0] == 0:
                break
        while True:                        # augment along the stored path
            j1 = way[j0]
            p[j0] = p[j1]
            j0 = j1
            if j0 == 0:
                break
    col_for_row = np.full(n, -1, dtype=np.int64)
    for j in range(1, m + 1):
        if p[j] != 0:
            col_for_row[p[j] - 1] = j - 1
    rows = np.arange(n, dtype=np.int64)
    if transposed:
        order = np.argsort(col_for_row)
        return col_for_row[order], rows[order]
    return rows, col_for_row


# ------------------------------- module -------------------------------------
class HungarianMatcherPallas:
    """JAX/Pallas port of the given HungarianMatcher.forward (literal semantics:
    num_queries = outputs.shape[2], C.view(bs, num_queries, -1).split(sizes, 0))."""

    def __init__(self, cost_bbox: float = 1.0):
        assert cost_bbox >= 0, "input pre-scaling requires cost_bbox >= 0"
        self.cost_bbox = float(cost_bbox)

    def __call__(self, outputs, targets):
        bs, num_queries = outputs.shape[0], outputs.shape[2]   # literal spec

        out_bbox = outputs.reshape(-1, outputs.shape[2])        # flatten(0, 1)
        tgt_bbox = jnp.concatenate(list(targets), axis=0)       # torch.cat
        N = out_bbox.shape[0]
        T = tgt_bbox.shape[0]

        # Single jitted dispatch: pre-scale + pad + transpose + Pallas kernel.
        # Result stays transposed & padded on device; slice/.T are free NumPy
        # views on host (the matrix is copied to host anyway).
        # TODO(synk): a block-diagonal (per-image) cost kernel would skip the
        # never-read cross-image entries, but deviates from the literal spec.
        n_pad, t_pad, tile_n, tile_t = _choose_tiles(N, T)
        c_t_pad = _l1_cdist_t_padded(
            out_bbox, tgt_bbox, jnp.float32(self.cost_bbox),
            n_pad=n_pad, t_pad=t_pad, tile_n=tile_n, tile_t=tile_t)

        c_t_host = np.asarray(jax.device_get(c_t_pad))          # one host sync
        C_host = c_t_host[:T, :N].T                             # numpy views
        C_host = C_host.reshape(bs, num_queries, -1)            # literal view()

        sizes = [int(v.shape[0]) for v in targets]
        chunks = np.split(C_host, np.cumsum(sizes)[:-1], axis=0)  # split dim 0
        indices = [_linear_sum_assignment_np(c[i]) for i, c in enumerate(chunks)]
        return [
            (np.asarray(i, dtype=np.int64), np.asarray(j, dtype=np.int64))
            for i, j in indices
        ]


# --------------------------------- demo --------------------------------------
if __name__ == "__main__":
    key = jax.random.PRNGKey(0)
    k1, k2, k3 = jax.random.split(key, 3)

    # Spec-literal shapes:
    #   outputs: [bs=3, 4, 4]  (num_queries := outputs.shape[2] = 4; shape[1]
    #            == shape[2] so the literal reshape is unambiguous)
    #   targets: box tensors with sizes [1, 2]  (sum == bs, as the literal
    #            reference's view(bs, num_queries, -1).split(sizes, 0) needs)
    outputs = jax.random.uniform(k1, (3, 4, 4), dtype=jnp.float32)
    targets = [
        jax.random.uniform(k2, (1, 4), dtype=jnp.float32),
        jax.random.uniform(k3, (2, 4), dtype=jnp.float32),
    ]

    # 1) Run the Pallas kernel once, block, and check against a pure-jnp ref.
    out_bbox = outputs.reshape(-1, outputs.shape[2])
    tgt_bbox = jnp.concatenate(targets, axis=0)
    cost = l1_cdist(out_bbox, tgt_bbox)
    jax.block_until_ready(cost)
    ref = jnp.sum(jnp.abs(out_bbox[:, None, :] - tgt_bbox[None, :, :]), axis=-1)
    assert cost.shape == (12, 3)
    assert np.allclose(np.asarray(cost), np.asarray(ref), rtol=1e-5, atol=1e-5)

    # 1b) Check the pre-scale path (scale folded into the inputs) too.
    n_pad, t_pad, tile_n, tile_t = _choose_tiles(12, 3)
    c_t_s = _l1_cdist_t_padded(
        out_bbox, tgt_bbox, jnp.float32(2.5),
        n_pad=n_pad, t_pad=t_pad, tile_n=tile_n, tile_t=tile_t)
    jax.block_until_ready(c_t_s)
    assert np.allclose(np.asarray(c_t_s)[:3, :12].T, 2.5 * np.asarray(ref),
                       rtol=1e-5, atol=1e-5)

    # 2) Sanity-check the host assignment solver against brute force (tiny).
    rng = np.random.default_rng(0)
    c_small = rng.random((4, 6))
    r_idx, c_idx = _linear_sum_assignment_np(c_small)
    brute = min(
        c_small[np.arange(4), list(p)].sum()
        for p in itertools.permutations(range(6), 4)
    )
    assert np.isclose(c_small[r_idx, c_idx].sum(), brute)

    # 3) Full matcher forward.
    matcher = HungarianMatcherPallas(cost_bbox=1.0)
    result = matcher(outputs, targets)

    # Per literal spec: C -> (3, 4, 3); each per-image cost chunk is (4, 3),
    # so each assignment has min(4, 3) = 3 matched pairs.
    assert len(result) == 2
    for i_idx, j_idx in result:
        assert i_idx.shape == (3,) and j_idx.shape == (3,)
        assert i_idx.dtype == np.int64 and j_idx.dtype == np.int64
        assert np.all(j_idx >= 0) and np.all(j_idx < 3)

    print("KERNEL_OK")
</pallas_src>

<mosaic_0001>
module attributes {stable_mosaic.version = 11 : i64} {
  func.func @_l1_cdist_kernel(%arg0: i32, %arg1: i32, %arg2: memref<4x128xf32, #tpu.memory_space<vmem>>, %arg3: memref<8x4xf32, #tpu.memory_space<vmem>>, %arg4: memref<8x128xf32, #tpu.memory_space<vmem>>) attributes {dimension_semantics = [#tpu.dimension_semantics<parallel>, #tpu.dimension_semantics<parallel>], iteration_bounds = array<i64: 1, 1>, scalar_prefetch = 0 : i64, scratch_operands = 0 : i64, tpu.core_type = #tpu.core_type<tc>, window_params = [{transform_indices = @transform_0, window_bounds = array<i64: 4, 128>}, {transform_indices = @transform_1, window_bounds = array<i64: 8, 4>}, {transform_indices = @transform_2, window_bounds = array<i64: 8, 128>}]} {
    %cst = arith.constant 0.000000e+00 : f32
    %0 = vector.broadcast %cst : f32 to vector<8x128xf32>
    %c0 = arith.constant 0 : index
    %c0_0 = arith.constant 0 : index
    %1 = vector.load %arg2[%c0, %c0_0] : memref<4x128xf32, #tpu.memory_space<vmem>>, vector<1x128xf32>
    %c0_1 = arith.constant 0 : index
    %c0_2 = arith.constant 0 : index
    %2 = vector.load %arg3[%c0_1, %c0_2] : memref<8x4xf32, #tpu.memory_space<vmem>>, vector<8x1xf32>
    %3 = vector.broadcast %1 : vector<1x128xf32> to vector<8x128xf32>
    %4 = vector.broadcast %2 : vector<8x1xf32> to vector<8x128xf32>
    %5 = arith.subf %3, %4 : vector<8x128xf32>
    %6 = math.absf %5 : vector<8x128xf32>
    %7 = arith.addf %0, %6 : vector<8x128xf32>
    %c1 = arith.constant 1 : index
    %c0_3 = arith.constant 0 : index
    %8 = vector.load %arg2[%c1, %c0_3] : memref<4x128xf32, #tpu.memory_space<vmem>>, vector<1x128xf32>
    %c0_4 = arith.constant 0 : index
    %c1_5 = arith.constant 1 : index
    %9 = vector.load %arg3[%c0_4, %c1_5] : memref<8x4xf32, #tpu.memory_space<vmem>>, vector<8x1xf32>
    %10 = vector.broadcast %8 : vector<1x128xf32> to vector<8x128xf32>
    %11 = vector.broadcast %9 : vector<8x1xf32> to vector<8x128xf32>
    %12 = arith.subf %10, %11 : vector<8x128xf32>
    %13 = math.absf %12 : vector<8x128xf32>
    %14 = arith.addf %7, %13 : vector<8x128xf32>
    %c2 = arith.constant 2 : index
    %c0_6 = arith.constant 0 : index
    %15 = vector.load %arg2[%c2, %c0_6] : memref<4x128xf32, #tpu.memory_space<vmem>>, vector<1x128xf32>
    %c0_7 = arith.constant 0 : index
    %c2_8 = arith.constant 2 : index
    %16 = vector.load %arg3[%c0_7, %c2_8] : memref<8x4xf32, #tpu.memory_space<vmem>>, vector<8x1xf32>
    %17 = vector.broadcast %15 : vector<1x128xf32> to vector<8x128xf32>
    %18 = vector.broadcast %16 : vector<8x1xf32> to vector<8x128xf32>
    %19 = arith.subf %17, %18 : vector<8x128xf32>
    %20 = math.absf %19 : vector<8x128xf32>
    %21 = arith.addf %14, %20 : vector<8x128xf32>
    %c3 = arith.constant 3 : index
    %c0_9 = arith.constant 0 : index
    %22 = vector.load %arg2[%c3, %c0_9] : memref<4x128xf32, #tpu.memory_space<vmem>>, vector<1x128xf32>
    %c0_10 = arith.constant 0 : index
    %c3_11 = arith.constant 3 : index
    %23 = vector.load %arg3[%c0_10, %c3_11] : memref<8x4xf32, #tpu.memory_space<vmem>>, vector<8x1xf32>
    %24 = vector.broadcast %22 : vector<1x128xf32> to vector<8x128xf32>
    %25 = vector.broadcast %23 : vector<8x1xf32> to vector<8x128xf32>
    %26 = arith.subf %24, %25 : vector<8x128xf32>
    %27 = math.absf %26 : vector<8x128xf32>
    %28 = arith.addf %21, %27 : vector<8x128xf32>
    %c0_12 = arith.constant 0 : index
    %c0_13 = arith.constant 0 : index
    %29 = vector.load %arg4[%c0_12, %c0_13] : memref<8x128xf32, #tpu.memory_space<vmem>>, vector<8x128xf32>
    tpu.vector_store %arg4[%c0_12, %c0_13], %28 {strides = array<i32>} : memref<8x128xf32, #tpu.memory_space<vmem>>, vector<8x128xf32>,
    return
  }
  func.func @transform_0(%arg0: i32, %arg1: i32) -> (i32, i32) {
    %c0_i32 = arith.constant 0 : i32
    %c0_i32_0 = arith.constant 0 : i32
    return %c0_i32, %arg1 : i32, i32
  }
  func.func @transform_1(%arg0: i32, %arg1: i32) -> (i32, i32) {
    %c0_i32 = arith.constant 0 : i32
    %c0_i32_0 = arith.constant 0 : i32
    return %arg0, %c0_i32 : i32, i32
  }
  func.func @transform_2(%arg0: i32, %arg1: i32) -> (i32, i32) {
    %c0_i32 = arith.constant 0 : i32
    return %arg0, %arg1 : i32, i32
  }
}

</mosaic_0001>

<bundles_post_ra>
// kernel: _l1_cdist_t_padded.1
= control target key start
LH: loop header
LB: loop body
LE: loop exit
PB: predicated region body
PF: predicated region fallthrough
CT: control target
= control target key end

     0   :  { %v115_v1 = vmov 0   ;;  %v116_v2 = vmov 2   ;;  %s162_s0 = inlined_call_operand.vmem [shape: f32[4,128], index: 0, kind: input, shape index: {}]   ;;  %s163_s1 = inlined_call_operand.vmem [shape: f32[8,4], index: 1, kind: input, shape index: {}]   ;;  %s164_s2 = inlined_call_operand.hbm [shape: f32[8,128], index: 2, kind: output, shape index: {}]  }
   0x1   :  { %v13_v0 = vld [vmem:[%s163_s1] sm:$0xff]  ;;  %86 = vset.pattern.permute.xlu0 %v115_v1  ;;  %88 = vset.pattern.permute.xlu1 %v116_v2 }
   0x2   :  { %7 = vsyncpa [#allocation3], 0  ;;  %20 = vperm.xlu0 %86, %v13_v0   ;;  %44 = vperm.xlu1 %88, %v13_v0   ;;  %v117_v3 = vmov 1   ;;  %v118_v4 = vmov 3   ;;  %v77_v7 = vld [vmem:[%s162_s0] ss:$0 sm:$0xff] }
   0x3   :  { %v79_v8 = vld [vmem:[%s162_s0 + $0x2] ss:$0 sm:$0xff]  ;;  %v78_v9 = vld [vmem:[%s162_s0 + $0x1] ss:$0 sm:$0xff]  ;;  %v80_v10 = vld [vmem:[%s162_s0 + $0x3] ss:$0 sm:$0xff] }
   0x4   :  { %s119_s18 = smov [#allocation2]  }
   0x5   :  { %s69_s19 = sshll.u32 %s119_s18, 4  ;;  %s70_s19 = int_to_ptr.vmem [resolvable:$true] %s69_s19 }
   0x6   :  { %87 = vset.pattern.permute.xlu0 %v117_v3  ;;  %89 = vset.pattern.permute.xlu1 %v118_v4  ;;  %s91_s20 = scalar_lea.vmem %s70_s19, 128  ;;  %p96_p1 = scmp.lt.s32.totalorder %s70_s19, %s70_s19 }
   0x7   :  { %32 = vperm.xlu0 %87, %v13_v0   ;;  %56 = vperm.xlu1 %89, %v13_v0   ;;  %p92_p0 = scmp.ne.s32.totalorder %s70_s19, %s91_s20  ;;  %p97_p2 = scmp.lt.s32.totalorder %s91_s20, %s91_s20 }
   0x9   :  { %p98_p3 = por %p97_p2, %p96_p1 }
   0xb   :  { %90 = vset.pattern.permute.xlu0 %v118_v4  ;;  %p99_p4 = pnand %p98_p3, %p92_p0 }
  0x81   :  { %v21_v5 = vpop.permute.xlu0 %20  ;;  %v45_v6 = vpop.permute.xlu1 %44 }
  0x82   :  { %v23_v11 = vsub.f32 %v77_v7, %v21_v5  ;;  %v47_v14 = vsub.f32 %v79_v8, %v45_v6 }
  0x84   :  { %v24_v17 = vand.u32 2147483647, %v23_v11  ;;  %v48_v19 = vand.u32 2147483647, %v47_v14 }
  0x86   :  { %v33_v12 = vpop.permute.xlu0 %32  ;;  %v57_v13 = vpop.permute.xlu1 %56 }
  0x87   :  { %v35_v15 = vsub.f32 %v78_v9, %v33_v12  ;;  %v59_v16 = vsub.f32 %v80_v10, %v57_v13 }
  0x89   :  { %v36_v18 = vand.u32 2147483647, %v35_v15  ;;  %v60_v21 = vand.u32 2147483647, %v59_v16 }
  0x8b   :  { %v37_v20 = vadd.f32 %v36_v18, %v24_v17 }
  0x8d   :  { %v49_v22 = vadd.f32 %v48_v19, %v37_v20 }
  0x8f   :  { %v61_v23 = vadd.f32 %v60_v21, %v49_v22 }
  0x91   :  { %62 = vst [vmem:[#allocation2] sm:$0xff] %v61_v23 }
  0x92   :  { %102 = shalt.err (!%p99_p4)
}
  0x93   :  { %s103_s22 = scalar_lea.hbm %s164_s2, 128 }
  0x94   :  { %p104_p5 = scmp.ne.s32.totalorder %s164_s2, %s103_s22  ;;  %p107_p6 = scmp.lt.u32.totalorder %s103_s22, %s164_s2 }
  0x96   :  { %p109_p7 = pnand %p107_p6, %p104_p5 }
  0x98   :  { %112 = shalt.err (!%p109_p7)
}
  0x99   :  { %72 = dma.vmem_to_hbm [thread:$0]  %s70_s19, 128, %s164_s2, [#allocation3]  }
  0x9a   :  { %113 = dma.done.wait [#allocation3], 128  }
  0x9b   :  { %114 = vsyncadd [#allocation3], 4294967168 }
  0x9c   :  { %76 = vsyncpa [#allocation3], 1 }

</bundles_post_ra>
